<compile_context>
chip_gen: v6e
topology: v6e:2x2x1
jax: 0.10.0
libtpu: 0.0.40
codegen_flags: <defaults>
</compile_context>

<pallas_src>
import jax
import jax.numpy as jnp
from jax.experimental import pallas as pl
from jax.experimental.pallas import tpu as pltpu


_VMEM_WORKING_SET_BUDGET = 20 * 1024 * 1024   # conservative; fits every gen's scoped VMEM
_VMEM_LIMIT_BYTES = 32 * 1024 * 1024          # > v5e's 16 MiB default, <= v7x physical


def _round_up(x, m):
    return ((x + m - 1) // m) * m


def _patch_embed_kernel(x_ref, w_ref, b_ref, o_ref):
    # x_ref: [TM, K], w_ref: [K, TE], b_ref: [1, TE] (f32), o_ref: [TM, TE]
    acc = jnp.dot(x_ref[...], w_ref[...], preferred_element_type=jnp.float32)
    o_ref[...] = (acc + b_ref[...]).astype(o_ref.dtype)


def patches_forward(x, weight, bias, patch_size, *,
                    compute_dtype=jnp.bfloat16, out_dtype=None):
    """Pallas implementation of Patches.forward.

    x:      (B, C, H, W)     float32 (or bf16)
    weight: (E, C, ph, pw)   float32 (PyTorch Conv2d weight layout)
    bias:   (E,)             float32
    returns (B, n_patch, E)  out_dtype (defaults to x.dtype)
    """
    B, C, H, W = x.shape
    E = weight.shape[0]
    ph, pw = patch_size
    gh, gw = H // ph, W // pw
    n_patch = gh * gw
    K = C * ph * pw
    M = B * n_patch
    out_dtype = x.dtype if out_dtype is None else out_dtype
    cs = jnp.dtype(compute_dtype).itemsize
    os_ = jnp.dtype(out_dtype).itemsize

    # --- host-side layout glue: cast FIRST, then extract patches -> [M, K] ---
    # (B, C, gh, ph, gw, pw) -> (B, gh, gw, C, ph, pw) -> (M, K); K order matches
    # the (E, C, ph, pw) weight reshape below.
    xc = x.astype(compute_dtype)
    xp = xc.reshape(B, C, gh, ph, gw, pw)
    xp = jnp.transpose(xp, (0, 2, 4, 1, 3, 5))
    x_patches = xp.reshape(M, K)

    # Conv weight (E, C, ph, pw) -> (K, E); bias kept in f32 for the epilogue add.
    w_mat = weight.reshape(E, K).T.astype(compute_dtype)
    b_mat = bias.reshape(1, E).astype(jnp.float32)

    # --- tiling -----------------------------------------------------------
    # E padded to 128 only (lane-dense output stores). K stays unpadded: the
    # block shape uses the full array extent, which Mosaic accepts.
    E_pad = _round_up(E, 128)

    if M >= 1024:
        TM = 512
    else:
        # Aim for >= 2 M tiles (v7x megacore) with rows a multiple of 16 (bf16
        # sublane packing).
        TM = max(16, min(_round_up((M + 1) // 2, 16), _round_up(M, 16)))
    M_pad = _round_up(M, TM)

    def working_set(tm, te):
        # Everything counted double-buffered (conservative).
        return 2 * (tm * K * cs + K * te * cs + te * 4 + tm * te * os_)

    # Keep the whole (padded) E as one tile — weight resident, loaded once —
    # unless VMEM genuinely forces a split; then pick a 128-multiple that
    # divides E_pad (no dead columns from re-rounding).
    TE = E_pad
    while working_set(TM, TE) > _VMEM_WORKING_SET_BUDGET and TE > 128:
        divisors = [t for t in range(128, TE, 128) if E_pad % t == 0]
        if not divisors:
            break
        TE = max(divisors)
    while working_set(TM, TE) > _VMEM_WORKING_SET_BUDGET and TM > 64:
        TM = max(64, TM // 2)
        M_pad = _round_up(M, TM)

    n_m = M_pad // TM
    n_e = E_pad // TE

    # Pad M (rows) and E (columns) only; K is left exactly as-is.
    x_patches = jnp.pad(x_patches, ((0, M_pad - M), (0, 0)))
    w_mat = jnp.pad(w_mat, ((0, 0), (0, E_pad - E)))
    b_mat = jnp.pad(b_mat, ((0, 0), (0, E_pad - E)))

    x_bytes = M_pad * K * cs
    w_bytes = K * E_pad * cs

    # Grid order: re-stream whichever operand costs fewer redundant HBM bytes.
    if n_e == 1 or w_bytes * (n_m - 1) <= x_bytes * (n_e - 1):
        # M outer, E inner: activation tile resident across the E sweep; weight
        # re-streamed once per M tile (free when n_e == 1 — weight loaded once).
        grid = (n_m, n_e)
        x_map = lambda i, j: (i, 0)
        w_map = lambda i, j: (0, j)
        b_map = lambda i, j: (0, j)
        o_map = lambda i, j: (i, j)
    else:
        # E outer, M inner: weight tile resident across the M sweep; activations
        # re-streamed once per E tile.
        grid = (n_e, n_m)
        x_map = lambda j, i: (i, 0)
        w_map = lambda j, i: (0, j)
        b_map = lambda j, i: (0, j)
        o_map = lambda j, i: (i, j)

    cost = pl.CostEstimate(
        flops=2 * M_pad * K * E_pad,
        transcendentals=0,
        bytes_accessed=(x_bytes + w_bytes + E_pad * 4 + M_pad * E_pad * os_),
    )

    out = pl.pallas_call(
        _patch_embed_kernel,
        out_shape=jax.ShapeDtypeStruct((M_pad, E_pad), out_dtype),
        grid_spec=pltpu.PrefetchScalarGridSpec(
            num_scalar_prefetch=0,
            grid=grid,
            in_specs=[
                pl.BlockSpec((TM, K), x_map),      # activations (full K — no pad)
                pl.BlockSpec((K, TE), w_map),      # weight
                pl.BlockSpec((1, TE), b_map),      # bias
            ],
            out_specs=pl.BlockSpec((TM, TE), o_map),
        ),
        compiler_params=pltpu.CompilerParams(
            dimension_semantics=("parallel", "parallel"),
            vmem_limit_bytes=_VMEM_LIMIT_BYTES,
        ),
        cost_estimate=cost,
    )(x_patches, w_mat, b_mat)

    # Slice off the M / E zero-padding, then restore (B, n_patch, E).
    return out[:M, :E].reshape(B, n_patch, E)


def _reference_forward(x, weight, bias, patch_size):
    """Pure-JAX reference using a real strided conv (matches nn.Conv2d)."""
    y = jax.lax.conv_general_dilated(
        x, weight,
        window_strides=patch_size,
        padding="VALID",
        dimension_numbers=("NCHW", "OIHW", "NCHW"),
    ) + bias[None, :, None, None]
    B, E, gh, gw = y.shape
    return jnp.transpose(y.reshape(B, E, gh * gw), (0, 2, 1))


if __name__ == "__main__":
    # Small config consistent with the module's forward pass.
    B, C = 2, 4
    img_size = (16, 16)
    patch_size = (4, 4)
    embedding_dim = 32

    key = jax.random.PRNGKey(0)
    kx, kw, kb = jax.random.split(key, 3)

    x = jax.random.normal(kx, (B, C, img_size[0], img_size[1]), dtype=jnp.float32)
    weight = jax.random.normal(
        kw, (embedding_dim, C, patch_size[0], patch_size[1]), dtype=jnp.float32
    ) * 0.05
    bias = jax.random.normal(kb, (embedding_dim,), dtype=jnp.float32) * 0.05

    ref = jax.block_until_ready(_reference_forward(x, weight, bias, patch_size))

    # f32 path: exact-ish match vs the conv reference (validates indexing/pad).
    out_f32 = jax.block_until_ready(
        patches_forward(x, weight, bias, patch_size, compute_dtype=jnp.float32))
    # bf16 path (production default): MXU-friendly inputs, f32 accumulation.
    out_bf16 = jax.block_until_ready(
        patches_forward(x, weight, bias, patch_size, compute_dtype=jnp.bfloat16))
    # bf16-output variant (halves store traffic for bf16 consumers): shape check only.
    out_bf16_out = jax.block_until_ready(
        patches_forward(x, weight, bias, patch_size,
                        compute_dtype=jnp.bfloat16, out_dtype=jnp.bfloat16))

    n_patch = (img_size[0] // patch_size[0]) * (img_size[1] // patch_size[1])
    assert out_f32.shape == (B, n_patch, embedding_dim), out_f32.shape
    assert out_bf16.shape == (B, n_patch, embedding_dim), out_bf16.shape
    assert out_bf16_out.shape == (B, n_patch, embedding_dim), out_bf16_out.shape
    assert out_bf16_out.dtype == jnp.bfloat16
    assert jnp.allclose(out_f32, ref, atol=1e-4, rtol=1e-4), "f32 mismatch vs conv reference"
    assert jnp.allclose(out_bf16, ref, atol=3e-2, rtol=3e-2), "bf16 mismatch vs conv reference"

    print("KERNEL_OK")
</pallas_src>

<mosaic_0001>
module attributes {stable_mosaic.version = 11 : i64} {
  func.func @_patch_embed_kernel(%arg0: i32, %arg1: i32, %arg2: memref<16x64xf32, #tpu.memory_space<vmem>>, %arg3: memref<64x128xf32, #tpu.memory_space<vmem>>, %arg4: memref<1x128xf32, #tpu.memory_space<vmem>>, %arg5: memref<16x128xf32, #tpu.memory_space<vmem>>) attributes {dimension_semantics = [#tpu.dimension_semantics<parallel>, #tpu.dimension_semantics<parallel>], iteration_bounds = array<i64: 2, 1>, scalar_prefetch = 0 : i64, scratch_operands = 0 : i64, tpu.core_type = #tpu.core_type<tc>, window_params = [{transform_indices = @transform_0, window_bounds = array<i64: 16, 64>}, {transform_indices = @transform_1, window_bounds = array<i64: 64, 128>}, {transform_indices = @transform_2, window_bounds = array<i64: 1, 128>}, {transform_indices = @transform_3, window_bounds = array<i64: 16, 128>}]} {
    %c0 = arith.constant 0 : index
    %c0_0 = arith.constant 0 : index
    %0 = vector.load %arg2[%c0, %c0_0] : memref<16x64xf32, #tpu.memory_space<vmem>>, vector<16x64xf32>
    %c0_1 = arith.constant 0 : index
    %c0_2 = arith.constant 0 : index
    %1 = vector.load %arg3[%c0_1, %c0_2] : memref<64x128xf32, #tpu.memory_space<vmem>>, vector<64x128xf32>
    %cst = arith.constant dense<0.000000e+00> : vector<16x128xf32>
    %2 = tpu.matmul %0, %1, %cst {dimension_numbers = #tpu.dot_dimension_numbers<[1], [0], [0], [1], [0, 0, 1, 1], [], []>} : vector<16x64xf32>, vector<64x128xf32>, vector<16x128xf32> -> vector<16x128xf32>
    %c0_3 = arith.constant 0 : index
    %c0_4 = arith.constant 0 : index
    %3 = vector.load %arg4[%c0_3, %c0_4] : memref<1x128xf32, #tpu.memory_space<vmem>>, vector<1x128xf32>
    %4 = vector.broadcast %3 : vector<1x128xf32> to vector<16x128xf32>
    %5 = arith.addf %2, %4 : vector<16x128xf32>
    %c0_5 = arith.constant 0 : index
    %c0_6 = arith.constant 0 : index
    %6 = vector.load %arg5[%c0_5, %c0_6] : memref<16x128xf32, #tpu.memory_space<vmem>>, vector<16x128xf32>
    tpu.vector_store %arg5[%c0_5, %c0_6], %5 {strides = array<i32>} : memref<16x128xf32, #tpu.memory_space<vmem>>, vector<16x128xf32>,
    return
  }
  func.func @transform_0(%arg0: i32, %arg1: i32) -> (i32, i32) {
    %c0_i32 = arith.constant 0 : i32
    %c0_i32_0 = arith.constant 0 : i32
    return %arg0, %c0_i32 : i32, i32
  }
  func.func @transform_1(%arg0: i32, %arg1: i32) -> (i32, i32) {
    %c0_i32 = arith.constant 0 : i32
    %c0_i32_0 = arith.constant 0 : i32
    return %c0_i32, %arg1 : i32, i32
  }
  func.func @transform_2(%arg0: i32, %arg1: i32) -> (i32, i32) {
    %c0_i32 = arith.constant 0 : i32
    %c0_i32_0 = arith.constant 0 : i32
    return %c0_i32, %arg1 : i32, i32
  }
  func.func @transform_3(%arg0: i32, %arg1: i32) -> (i32, i32) {
    %c0_i32 = arith.constant 0 : i32
    return %arg0, %arg1 : i32, i32
  }
}

</mosaic_0001>

<bundles_post_ra>
// kernel: tpu_custom_call.1
= control target key start
LH: loop header
LB: loop body
LE: loop exit
PB: predicated region body
PF: predicated region fallthrough
CT: control target
= control target key end

     0   :  { %8 = vsyncpa [#allocation3], 0  ;;  %s956_s0 = inlined_call_operand.hbm [shape: f32[32,64], index: 0, kind: input, shape index: {}]   ;;  %s957_s1 = inlined_call_operand.hbm [shape: f32[64,128], index: 1, kind: input, shape index: {}]   ;;  %s958_s2 = inlined_call_operand.vmem [shape: f32[1,128], index: 2, kind: input, shape index: {}]   ;;  %s959_s3 = inlined_call_operand.hbm [shape: f32[32,128], index: 3, kind: output, shape index: {}]  }
   0x1   :  { %10 = vsyncpa [#allocation3 + $0x1], 0 }
   0x2   :  { %11 = vsyncpa [#allocation6], 0 }
   0x3   :  { %12 = vsyncpa [#allocation4], 0 }
   0x4   :  { %14 = vsyncpa [#allocation4 + $0x1], 0  ;;  %s760_s12 = smov 0   ;;  %s762_s13 = smov 0  }
   0x5   :  { %s764_s14 = smov 0   ;;  %s766_s15 = smov 0  }
   0x6   :  { %s768_s16 = smov 0   ;;  %s770_s17 = smov 0  }
   0x7 LB: > { %s464_s18 = sadd.s32 4294967295, %s731_s17   ;;  %s465_s19 = sadd.s32 4294967294, %s731_s17   ;;  %s731_s17 = sphi %s770_s17, %s20_s17   ;;  %s727_s16 = sphi %s768_s16, %s981_s16   ;;  %s723_s15 = sphi %s766_s15, %s980_s15   ;;  %s719_s14 = sphi %s764_s14, %s979_s14   ;;  %s715_s13 = sphi %s762_s13, %s978_s13   ;;  %s711_s12 = sphi %s760_s12, %s977_s12  }
   0x8   : > { %p52_p0 = scmp.ne.s32.totalorder %s715_s13, %s711_s12  ;;  %p794_p1 = scmp.eq.s32.totalorder %s464_s18, 0 }
   0x9   : > { %p798_p2 = scmp.eq.s32.totalorder %s464_s18, 1  ;;  %p136_p3 = scmp.eq.s32.totalorder %s465_s19, 1 }
   0xa   : > { %p804_p4 = por %p794_p1, %p52_p0  ;;  %p466_p5 = scmp.ge.s32.totalorder %s731_s17, 1 }
   0xb   : > { %p809_p6 = por %p136_p3, %p52_p0  ;;  %p143_p7 = scmp.lt.s32.totalorder %s731_s17, 3 }
   0xc   : > { %s965_s22 = scalar_select %p804_p4, 1, 0 }
   0xd   : > { %s966_s23 = scalar_select %p809_p6, 1, 0 }
   0xe   : > { %p814_p8 = pnand %p466_p5, %p143_p7  ;;  %s733_s25 = smov [#allocation5]  }
   0xf   : > { %s157_s26 = sshll.u32 %s733_s25, 4  ;;  %s32_s28 = sadd.s32 1, %s727_s16  ;;  %s158_s26 = int_to_ptr.vmem [resolvable:$true] %s157_s26 }
  0x10   : > { %p524_p9 = pneg %p814_p8  ;;  %s604_s29 = scalar_lea.vmem %s158_s26, 1024 }
  0x11   : > { %p605_p13 = scmp.ne.s32.totalorder %s158_s26, %s604_s29  ;;  %p612_p5 = scmp.lt.s32.totalorder %s158_s26, %s158_s26 }
  0x12   : > { %p823_p11 = pnand %p524_p9, %p794_p1  ;;  %p613_p7 = scmp.lt.s32.totalorder %s604_s29, %s604_s29 }
  0x14   : > { %p595_p12 = pneg %p823_p11  ;;  %p614_p6 = por %p613_p7, %p612_p5 }
  0x16   : > { %p607_p0 = pnand %p605_p13, %p595_p12 }
  0x18   : > { %p608_p3 = pneg %p607_p0 }
  0x1a   : > { %p615_p4 = pnand %p614_p6, %p608_p3 }
  0x1c   : > { %618 = shalt.err (!%p615_p4)
}
  0x1d   : > { %s961_s30 = smov 128   ;;  %s962_s4 = smov 8  }
  0x1e   : > { %527 = dma.hbm_to_vmem [thread:$0]  (!%p823_p11), %s957_s1, 1024, %s158_s26, [#allocation6], %s961_s30, %s961_s30, %s962_s4  }
  0x1f   : > { %p34_p4 = scmp.ge.s32.totalorder %s32_s28, 2  ;;  %s39_s7 = sadd.s32 1, %s719_s14 }
  0x20   : > { %p46_p6 = scmp.ne.s32.totalorder %s719_s14, %s715_s13  ;;  %p47_p9 = scmp.eq.s32.totalorder %s731_s17, 0 }
  0x21   : > { %s983_s28 = smov (%p34_p4, %s32_s28), 0  ;;  %p537_p0 = scmp.lt.s32.totalorder %s731_s17, 2 }
  0x22   : > { %p844_p12 = por %p47_p9, %p46_p6  ;;  %p850_p13 = por %p798_p2, %p46_p6 }
  0x23   : > { %s36_s10 = ssub.s32 %s727_s16, %s983_s28  ;;  %s177_s11 = sand.u32 1, %s719_s14  }
  0x24   : > { %p37_p11 = scmp.eq.s32.totalorder %s36_s10, 0  ;;  %s470_s18 = sshll.u32 %s177_s11, 4 }
  0x25   : > { %s485_s25 = sshll.u32 %s727_s16, 8  ;;  %s181_s5 = scalar_lea.vmem [#allocation2], %s470_s18 }
  0x26   : > { %s859_s19 = scalar_select %p37_p11, %s719_s14, %s39_s7  }
  0x27   : > { %s187_s29 = scalar_lea.hbm %s956_s0, %s485_s25  ;;  %s188_s6 = sshll.u32 %s181_s5, 4  ;;  %s189_s6 = int_to_ptr.vmem [resolvable:$true] %s188_s6 }
  0x28   : > { %p867_p2 = pnand %p537_p0, %p844_p12  ;;  %s178_s30 = scalar_lea.sflag [#allocation3], %s177_s11 }
  0x29   : > { %s632_s10 = scalar_lea.vmem %s189_s6, 256  ;;  %s736_s7 = smov [#allocation2]  }
  0x2a   : > { %p621_p3 = pneg %p867_p2  ;;  %p633_p5 = scmp.ne.s32.totalorder %s189_s6, %s632_s10 }
  0x2b   : > { %s637_s4 = sshll.u32 %s736_s7, 4  ;;  %s638_s4 = int_to_ptr.vmem [resolvable:$false] %s637_s4 }
  0x2c   : > { %p635_p7 = pnand %p633_p5, %p621_p3  ;;  %s639_s25 = scalar_lea.vmem %s638_s4, 512 }
  0x2d   : > { %p640_p6 = scmp.lt.s32.totalorder %s189_s6, %s638_s4  ;;  %p641_p9 = scmp.lt.s32.totalorder %s639_s25, %s632_s10 }
  0x2e   : > { %p636_p4 = pneg %p635_p7 }
  0x2f   : > { %p642_p11 = por %p641_p9, %p640_p6 }
  0x31   : > { %p643_p10 = pnand %p642_p11, %p636_p4 }
  0x33   : > { %646 = shalt.err (!%p643_p10)
}
  0x34   : > { %s972_s8 = smov 8   ;;  %s973_s18 = smov 128  }
  0x35   : > { %531 = dma.hbm_to_vmem [thread:$0]  (!%p867_p2), %s187_s29, 256, %s189_s6, %s178_s30, %s973_s18, %s973_s18, %s972_s8  }
  0x36   : > { %200 = sbr.rel (%p814_p8) target bundleno = 290 (0x122), region = 32  ;;  %s881_s11 = sand.u32 (!%p814_p8), 1, %s715_s13  }
  0x37   : > { %s474_s4 = sshll.u32 (!%p814_p8), %s881_s11, 4  ;;  %s203_s26 = scalar_lea.sflag (!%p814_p8), [#allocation3], %s881_s11 }
  0x38   : > { %s206_s27 = scalar_lea.vmem (!%p814_p8), [#allocation2], %s474_s4  ;;  %p974_p10 = scmp.ne.s32.totalorder (!%p814_p8), %s965_s22, 0 }
  0x3b   : > { %698 = dma.done.wait (%p974_p10), %s203_s26, 256  }
  0x3c   : > { %700 = vsyncadd (%p974_p10), %s203_s26, 4294967040 }
  0x3d   : > { %702 = dma.done.wait (%p794_p1), [#allocation6], 1024  }
  0x3e   : > { %704 = vsyncadd (%p794_p1), [#allocation6], 4294966272  ;;  %v250_v0 = vld [vmem:[#allocation5 + $0x38] sm:$0xff]  ;;  %v249_v1 = vld [vmem:[#allocation5 + $0x30] sm:$0xff]  ;;  %vm258_vm0 = vcmask 523264   ;;  %s235_s24 = scalar_lea.vmem [#allocation7], %s474_s4 }
  0x3f   : > { %497 = vmatprep.subr.mxu0 %v250_v0  ;;  %v248_v2 = vld [vmem:[#allocation5 + $0x28] sm:$0xff]  ;;  %v241_v3 = vld [vmem:[%s206_s27] sm:$0xff]  ;;  %v246_v5 = vld [vmem:[#allocation5 + $0x18] sm:$0xff]  ;;  %s357_s30 = sshll.u32 %s235_s24, 4  ;;  %s486_s29 = sshll.u32 %s723_s15, 8  ;;  %s903_s30 = int_to_ptr.vmem [resolvable:$true] %s357_s30 }
  0x40   : > { %498 = vmatpush3.msra.mxu0 %v250_v0  ;;  %513 = vmatprep.mubr.msk.f32.mxu0 %vm258_vm0, %v241_v3  ;;  %v247_v4 = vld [vmem:[#allocation5 + $0x20] sm:$0xff]  ;;  %v245_v6 = vld [vmem:[#allocation5 + $0x10] sm:$0xff]  ;;  %v244_v7 = vld [vmem:[#allocation5 + $0x8] sm:$0xff]  ;;  %s908_s21 = scalar_lea.hbm %s959_s3, %s486_s29  ;;  %s343_s10 = scalar_lea.sflag [#allocation4], %s881_s11 }
  0x41   : > { %499 = vmatprep.subr.mxu0 %v249_v1  ;;  %v243_v8 = vld [vmem:[#allocation5] sm:$0xff]  ;;  %v242_v9 = vld [vmem:[%s206_s27 + $0x8] sm:$0xff]  ;;  %s647_s7 = scalar_lea.vmem %s903_s30, 256  ;;  %s737_s15 = smov [#allocation7]  }
  0x42   : > { %500 = vmatpush3.msra.mxu0 %v249_v1  ;;  %v477_v10 = vld [vmem:[%s958_s2] ss:$0 sm:$0xff]  ;;  %p648_p1 = scmp.ne.s32.totalorder %s903_s30, %s647_s7  ;;  %s651_s25 = sshll.u32 %s737_s15, 4  ;;  %s652_s25 = int_to_ptr.vmem [resolvable:$false] %s651_s25 }
  0x43   : > { %501 = vmatprep.subr.mxu0 %v248_v2  ;;  %s653_s8 = scalar_lea.vmem %s652_s25, 512  ;;  %p654_p0 = scmp.lt.s32.totalorder %s903_s30, %s652_s25 }
  0x44   : > { %502 = vmatpush3.msra.mxu0 %v248_v2  ;;  %p649_p8 = pnand %p648_p1, %p850_p13  ;;  %p655_p2 = scmp.lt.s32.totalorder %s653_s8, %s647_s7 }
  0x45   : > { %503 = vmatprep.subr.mxu0 %v247_v4 }
  0x46   : > { %504 = vmatpush3.msra.mxu0 %v247_v4  ;;  %p650_p12 = pneg %p649_p8  ;;  %p656_p3 = por %p655_p2, %p654_p0 }
  0x47   : > { %505 = vmatprep.subr.mxu0 %v246_v5 }
  0x48   : > { %506 = vmatpush3.msra.mxu0 %v246_v5  ;;  %p657_p5 = pnand %p656_p3, %p650_p12 }
  0x49   : > { %507 = vmatprep.subr.mxu0 %v245_v6 }
  0x4a   : > { %508 = vmatpush3.msra.mxu0 %v245_v6 }
  0x4b   : > { %509 = vmatprep.subr.mxu0 %v244_v7 }
  0x4c   : > { %510 = vmatpush3.msra.mxu0 %v244_v7 }
  0x4d   : > { %511 = vmatprep.subr.mxu0 %v243_v8 }
  0x4e   : > { %512 = vmatpush3.msra.mxu0 %v243_v8 }
  0x4f   : > { %514 = vmatmul.mubr.msk.f32.vlgmr.msra.gmra.mxu0 %vm258_vm0, %v242_v9 }
 0x10f   : > { %v515_v11 = vpop.f32.mrf.mxu0 }
 0x110   : > { %v337_v12 = vadd.f32 %v515_v11, %v477_v10 }
 0x111   : > { %v331_v13 = vpop.f32.mrf.mxu0 }
 0x112   : > { %341 = vst [vmem:[%s235_s24 + $0x8] sm:$0xff] %v337_v12  ;;  %v332_v14 = vadd.f32 %v477_v10, %v331_v13 }
 0x114   : > { %340 = vst [vmem:[%s235_s24] sm:$0xff] %v332_v14 }
 0x115   : > { %660 = shalt.err (!%p657_p5)
}
 0x116   : > { %s661_s18 = scalar_lea.hbm %s908_s21, 256  ;;  %s665_s27 = scalar_lea.hbm %s959_s3, 512 }
 0x117   : > { %p662_p7 = scmp.ne.s32.totalorder %s908_s21, %s661_s18  ;;  %p666_p9 = scmp.lt.s32.totalorder %s908_s21, %s959_s3 }
 0x118   : > { %p667_p11 = scmp.lt.s32.totalorder %s665_s27, %s661_s18 }
 0x119   : > { %p663_p4 = pnand %p662_p7, %p850_p13 }
 0x11a   : > { %p668_p10 = por %p667_p11, %p666_p9 }
 0x11b   : > { %p664_p6 = pneg %p663_p4 }
 0x11d   : > { %p669_p1 = pnand %p668_p10, %p664_p6 }
 0x11f   : > { %672 = shalt.err (!%p669_p1)
}
 0x120   : > { %s738_s24 = smov 128   ;;  %s739_s29 = smov 8  }
 0x121   : > { %522 = dma.vmem_to_hbm [thread:$0]  (%p850_p13), %s903_s30, 256, %s908_s21, %s343_s10, %s738_s24, %s738_s24, %s739_s29  }
 0x122 PF: > { %s372_s5 = sand.u32 1, %s711_s12   ;;  %p975_p8 = scmp.ne.s32.totalorder %s966_s23, 0 }
 0x123   : > { %p976_p12 = scmp.ge.s32.totalorder %s731_s17, 2  ;;  %s373_s6 = scalar_lea.sflag [#allocation4], %s372_s5 }
 0x125   : > { %p533_p0 = pnand %p976_p12, %p975_p8 }
 0x127   : > { %p534_p2 = pneg %p533_p0 }
 0x129   : > { %706 = dma.done.wait (%p534_p2), %s373_s6, 256  }
 0x12a   : > { %708 = vsyncadd (%p534_p2), %s373_s6, 4294967040  ;;  %s20_s17 = sadd.s32 1, %s731_s17   ;;  %s977_s12 = smov %s715_s13 }
 0x12b   : > { %p17_p3 = scmp.ge.s32.totalorder %s20_s17, 4   ;;  %s978_s13 = smov %s719_s14 }
 0x12c   : > { %s979_s14 = smov %s859_s19  ;;  %s980_s15 = smov %s727_s16 }
 0x12d   : > { %s981_s16 = smov %s983_s28  ;;  %19 = sbr.rel (!%p17_p3) target bundleno = 7 (0x7), region = 85 }
 0x132   :  { %378 = vsyncpa [#allocation3], 1 }
 0x133   :  { %380 = vsyncpa [#allocation3 + $0x1], 1 }
 0x134   :  { %381 = vsyncpa [#allocation6], 1 }
 0x135   :  { %382 = vsyncpa [#allocation4], 1 }
 0x136   :  { %384 = vsyncpa [#allocation4 + $0x1], 1 }

</bundles_post_ra>
